<compile_context>
chip_gen: v6e
topology: v6e:2x2x1
jax: 0.10.0
libtpu: 0.0.40
codegen_flags: <defaults>
</compile_context>

<pallas_src>
import jax
import jax.numpy as jnp
from jax.experimental import pallas as pl
from jax.experimental.pallas import tpu as pltpu

_LANES = 128
_MIN_SUBLANES = 32                       # packed min-tile second-minor for int8/fp8; free for f32/bf16
_TARGET_BLOCK_BYTES = 2 * 1024 * 1024    # portable 2 MiB blocks (~85%+ of HBM roofline, fits all gens)


def _round_up(x: int, m: int) -> int:
    return ((x + m - 1) // m) * m


def _round_down(x: int, m: int) -> int:
    return (x // m) * m


def _identity_kernel(x_ref, o_ref):
    # Whole-tile load + whole-tile store; lane-dense so stores are unmasked.
    o_ref[...] = x_ref[...]


def _pallas_identity(embs: jax.Array) -> jax.Array:
    """Identity copy of embs through a Pallas kernel using a lane-dense (rows, 128) layout."""
    orig_shape = embs.shape
    dtype = embs.dtype
    total = int(embs.size)

    # Flatten, pad to a multiple of (32 x 128) so the 2D view is a legal,
    # lane-dense tile for every supported dtype, then reshape to (rows, 128).
    flat = embs.reshape(-1)
    padded_total = _round_up(max(total, 1), _MIN_SUBLANES * _LANES)
    if padded_total != total:
        flat = jnp.pad(flat, (0, padded_total - total))
    rows = padded_total // _LANES
    x2d = flat.reshape(rows, _LANES)

    # Block sizing:
    #  * cap at ~2 MiB (portable across v5e/v6e/v7x default scoped VMEM),
    #  * round to 32 sublanes (dtype-safe min tile),
    #  * force >= 2 grid steps when the tensor spans more than one min tile,
    #    so megacore sharding and in/out DMA overlap are not defeated.
    bytes_per_row = _LANES * dtype.itemsize
    budget_rows = max(_MIN_SUBLANES,
                      _round_down(_TARGET_BLOCK_BYTES // bytes_per_row, _MIN_SUBLANES))
    half_rows = _round_up(pl.cdiv(rows, 2), _MIN_SUBLANES)
    block_rows = max(_MIN_SUBLANES, min(rows, budget_rows, half_rows))

    grid = (pl.cdiv(rows, block_rows),)

    # Explicit VMEM budget: double-buffered input + output blocks plus headroom.
    block_bytes = block_rows * bytes_per_row
    vmem_limit = 4 * block_bytes + (4 << 20)

    out2d = pl.pallas_call(
        _identity_kernel,
        out_shape=jax.ShapeDtypeStruct((rows, _LANES), dtype),
        grid=grid,
        in_specs=[pl.BlockSpec((block_rows, _LANES), lambda i: (i, 0))],
        out_specs=pl.BlockSpec((block_rows, _LANES), lambda i: (i, 0)),
        compiler_params=pltpu.CompilerParams(
            dimension_semantics=("parallel",),
            vmem_limit_bytes=vmem_limit,
        ),
    )(x2d)

    return out2d.reshape(-1)[:total].reshape(orig_shape)


class NullPhraseLayer:
    """Dummy phrase layer that does nothing. Exists solely for API compatibility."""

    def __init__(self, input_dim: int):
        self.input_dim = input_dim

    def get_input_dim(self) -> int:
        return self.input_dim

    def get_output_dim(self) -> int:
        return 0

    def forward(self, embs, mask):
        # Exact PyTorch semantics: no compute, return None. No kernel launched.
        return None

    __call__ = forward


if __name__ == "__main__":
    key = jax.random.PRNGKey(0)
    k_embs, k_mask, k_rag = jax.random.split(key, 3)

    # Shapes implied by the module interface: embs [B, S, H], mask [B, S].
    B, S, H = 2, 8, 32
    embs = jax.random.normal(k_embs, (B, S, H), dtype=jnp.float32)
    mask = (jax.random.uniform(k_mask, (B, S)) > 0.2).astype(jnp.int32)

    # Exercise the lane-dense Pallas identity kernel (test harness only).
    passthrough = _pallas_identity(embs)
    jax.block_until_ready(passthrough)
    assert passthrough.shape == (B, S, H)
    assert jnp.array_equal(passthrough, embs)

    # Ragged + bf16 case: exercises the pad-to-(32,128) path and dtype-safe tiling.
    embs_ragged = jax.random.normal(k_rag, (2, 8, 33), dtype=jnp.bfloat16)
    passthrough_ragged = _pallas_identity(embs_ragged)
    jax.block_until_ready(passthrough_ragged)
    assert passthrough_ragged.shape == embs_ragged.shape
    assert jnp.array_equal(passthrough_ragged, embs_ragged)

    # Module-level semantics: forward returns None, output dim is 0.
    layer = NullPhraseLayer(input_dim=H)
    out = layer(embs, mask)
    assert out is None
    assert layer.get_input_dim() == H
    assert layer.get_output_dim() == 0

    print("KERNEL_OK")
</pallas_src>

<mosaic_0001>
module attributes {stable_mosaic.version = 11 : i64} {
  func.func @_identity_kernel(%arg0: i32, %arg1: memref<32x128xf32, #tpu.memory_space<vmem>>, %arg2: memref<32x128xf32, #tpu.memory_space<vmem>>) attributes {dimension_semantics = [#tpu.dimension_semantics<parallel>], iteration_bounds = array<i64: 1>, scalar_prefetch = 0 : i64, scratch_operands = 0 : i64, tpu.core_type = #tpu.core_type<tc>, window_params = [{transform_indices = @transform_0, window_bounds = array<i64: 32, 128>}, {transform_indices = @transform_1, window_bounds = array<i64: 32, 128>}]} {
    %c0 = arith.constant 0 : index
    %c0_0 = arith.constant 0 : index
    %0 = vector.load %arg1[%c0, %c0_0] : memref<32x128xf32, #tpu.memory_space<vmem>>, vector<32x128xf32>
    %c0_1 = arith.constant 0 : index
    %c0_2 = arith.constant 0 : index
    %1 = vector.load %arg2[%c0_1, %c0_2] : memref<32x128xf32, #tpu.memory_space<vmem>>, vector<32x128xf32>
    tpu.vector_store %arg2[%c0_1, %c0_2], %0 {strides = array<i32>} : memref<32x128xf32, #tpu.memory_space<vmem>>, vector<32x128xf32>,
    return
  }
  func.func @transform_0(%arg0: i32) -> (i32, i32) {
    %c0_i32 = arith.constant 0 : i32
    %c0_i32_0 = arith.constant 0 : i32
    return %arg0, %c0_i32 : i32, i32
  }
  func.func @transform_1(%arg0: i32) -> (i32, i32) {
    %c0_i32 = arith.constant 0 : i32
    %c0_i32_0 = arith.constant 0 : i32
    return %arg0, %c0_i32 : i32, i32
  }
}

</mosaic_0001>

<bundles_post_ra>
// kernel: tpu_custom_call.1
= control target key start
LH: loop header
LB: loop body
LE: loop exit
PB: predicated region body
PF: predicated region fallthrough
CT: control target
= control target key end

     0   :  { %6 = vsyncpa [#allocation3], 0  ;;  %s116_s0 = inlined_call_operand.hbm [shape: f32[32,128], index: 0, kind: input, shape index: {}]   ;;  %s117_s1 = inlined_call_operand.hbm [shape: f32[32,128], index: 1, kind: output, shape index: {}]  }
   0x1   :  { %7 = vsyncpa [#allocation4], 0  ;;  %s96_s6 = smov [#allocation2]  }
   0x2   :  { %s13_s7 = sshll.u32 %s96_s6, 4  ;;  %s14_s7 = int_to_ptr.vmem [resolvable:$true] %s13_s7 }
   0x3   :  { %s60_s8 = scalar_lea.vmem %s14_s7, 512  ;;  %p65_p1 = scmp.lt.s32.totalorder %s14_s7, %s14_s7 }
   0x4   :  { %p61_p0 = scmp.ne.s32.totalorder %s14_s7, %s60_s8  ;;  %p66_p2 = scmp.lt.s32.totalorder %s60_s8, %s60_s8 }
   0x6   :  { %p67_p3 = por %p66_p2, %p65_p1 }
   0x8   :  { %p68_p4 = pnand %p67_p3, %p61_p0 }
   0xa   :  { %71 = shalt.err (!%p68_p4)
}
   0xb   :  { %s97_s9 = smov 128   ;;  %s98_s10 = smov 8  }
   0xc   :  { %19 = dma.hbm_to_vmem [thread:$0]  %s116_s0, 512, %s14_s7, [#allocation3], %s97_s9, %s97_s9, %s98_s10  }
   0xd   :  { %92 = dma.done.wait [#allocation3], 512  }
   0xe   :  { %93 = vsyncadd [#allocation3], 4294966784  ;;  %s99_s13 = smov [#allocation5]   ;;  %v23_v0 = vld [vmem:[#allocation2] sm:$0xff]  ;;  %v24_v1 = vld [vmem:[#allocation2 + $0x8] sm:$0xff] }
   0xf   :  { %s36_s14 = sshll.u32 %s99_s13, 4  ;;  %v25_v2 = vld [vmem:[#allocation2 + $0x10] sm:$0xff]  ;;  %27 = vst [vmem:[#allocation5] sm:$0xff] %v23_v0  ;;  %28 = vst [vmem:[#allocation5 + $0x8] sm:$0xff] %v24_v1  ;;  %v26_v3 = vld [vmem:[#allocation2 + $0x18] sm:$0xff]  ;;  %s37_s14 = int_to_ptr.vmem [resolvable:$true] %s36_s14 }
  0x10   :  { %29 = vst [vmem:[#allocation5 + $0x10] sm:$0xff] %v25_v2  ;;  %30 = vst [vmem:[#allocation5 + $0x18] sm:$0xff] %v26_v3  ;;  %s72_s15 = scalar_lea.vmem %s37_s14, 512  ;;  %p77_p6 = scmp.lt.s32.totalorder %s37_s14, %s37_s14 }
  0x11   :  { %p73_p5 = scmp.ne.s32.totalorder %s37_s14, %s72_s15  ;;  %p78_p7 = scmp.lt.s32.totalorder %s72_s15, %s72_s15 }
  0x13   :  { %p79_p8 = por %p78_p7, %p77_p6 }
  0x15   :  { %p80_p9 = pnand %p79_p8, %p73_p5 }
  0x17   :  { %83 = shalt.err (!%p80_p9)
}
  0x18   :  { %42 = dma.vmem_to_hbm [thread:$0]  %s37_s14, 512, %s117_s1, [#allocation4], %s97_s9, %s97_s9, %s98_s10  }
  0x19   :  { %94 = dma.done.wait [#allocation4], 512  }
  0x1a   :  { %95 = vsyncadd [#allocation4], 4294966784 }
  0x1b   :  { %46 = vsyncpa [#allocation3], 1 }
  0x1c   :  { %47 = vsyncpa [#allocation4], 1 }

</bundles_post_ra>
